<compile_context>
chip_gen: v5e
topology: v5e:2x2
jax: 0.10.0
libtpu: 0.0.40
codegen_flags: <defaults>
</compile_context>

<pallas_src>
import functools

import jax
import jax.numpy as jnp
from jax.experimental import pallas as pl
from jax.experimental.pallas import tpu as pltpu


def _round_up(x, m):
    return (x + m - 1) // m * m


def _vmem_capacity_bytes():
    try:
        return int(pltpu.get_tpu_info().vmem_capacity_bytes)
    except Exception:
        return 64 * 1024 * 1024  # conservative: v7x per-TensorCore VMEM


def _vmem_footprint(tm, in_c, out_c, dims, compute_bytes):
    """Rough upper bound of the kernel's VMEM footprint in bytes."""
    x_tile = 2 * tm * in_c * 4           # double-buffered f32 input tile
    o_tile = 2 * tm * out_c * 4          # double-buffered f32 output tile
    wb = sum(2 * (d_in * d_out * compute_bytes + d_out * 4) for d_in, d_out in dims)
    widest = max(max(d_in, d_out) for d_in, d_out in dims)
    live = 3 * tm * widest * 4           # a few live f32 intermediates
    return x_tile + o_tile + wb + live


def _fused_mlp_kernel(*refs, num_layers, residual_flags, compute_dtype):
    """Fused MLP for one row tile: o = layer_{L-1}(...layer_0(x)...).

    refs = (x_ref, w0, b0, w1, b1, ..., w_{L-1}, b_{L-1}, o_ref)
      x_ref : (TM, C0)       float32 (cast to compute_dtype in-kernel)
      w_i   : (Cin, Cout)    compute_dtype (bf16), VMEM-resident
      b_i   : (1, Cout)      float32, VMEM-resident
      o_ref : (TM, C_last)   float32
    """
    x_ref = refs[0]
    o_ref = refs[1 + 2 * num_layers]

    x_prev = x_ref[...].astype(jnp.float32)   # residual kept in f32
    h = x_prev.astype(compute_dtype)          # MXU operand

    for i in range(num_layers):
        w = refs[1 + 2 * i][...]              # (Cin, Cout)
        b = refs[2 + 2 * i][...]              # (1, Cout) f32
        # MXU matmul with f32 accumulation + fused bias add.
        y = jnp.dot(h, w, preferred_element_type=jnp.float32) + b
        if i < num_layers - 1:
            y = jnp.maximum(y, 0.0)           # ReLU on hidden layers only
        if residual_flags[i]:
            y = y + x_prev                    # residual (shape-gated statically)
        # dropout: identity in eval mode.
        x_prev = y
        if i < num_layers - 1:
            h = y.astype(compute_dtype)

    o_ref[...] = x_prev.astype(o_ref.dtype)


def init_mlp_params(key, in_channels, hidden_channels, out_channels, num_layers):
    """Deterministic parameter init (PyTorch-Linear-like uniform bounds).

    Weights are stored already transposed: [Din, Dout].
    """
    if num_layers == 1:
        dims = [(in_channels, out_channels)]
    else:
        dims = [(in_channels, hidden_channels)]
        dims += [(hidden_channels, hidden_channels)] * (num_layers - 2)
        dims += [(hidden_channels, out_channels)]

    params = []
    for (d_in, d_out) in dims:
        key, kw, kb = jax.random.split(key, 3)
        bound = 1.0 / jnp.sqrt(d_in)
        w_t = jax.random.uniform(kw, (d_in, d_out), jnp.float32, -bound, bound)
        b = jax.random.uniform(kb, (d_out,), jnp.float32, -bound, bound)
        params.append((w_t, b))
    return params


def prepare_params(params, compute_dtype=jnp.bfloat16):
    """One-time, hoisted out of the forward: cast W to the MXU compute dtype
    and reshape biases to (1, Dout) float32."""
    return [(w_t.astype(compute_dtype), b.reshape(1, -1).astype(jnp.float32))
            for (w_t, b) in params]


def _xla_forward(prepared_params, x, residual_flags, compute_dtype):
    """Plain-XLA path (tiny-batch fallback); mirrors the kernel arithmetic."""
    num_layers = len(prepared_params)
    x_prev = x.astype(jnp.float32)
    h = x_prev.astype(compute_dtype)
    for i, (w, b) in enumerate(prepared_params):
        y = jnp.dot(h, w, preferred_element_type=jnp.float32) + b
        if i < num_layers - 1:
            y = jnp.maximum(y, 0.0)
        if residual_flags[i]:
            y = y + x_prev
        x_prev = y
        if i < num_layers - 1:
            h = y.astype(compute_dtype)
    return x_prev.astype(x.dtype)


def _reference_forward(prepared_params, x, *, residual=True,
                       compute_dtype=jnp.bfloat16):
    dims = [(w.shape[0], w.shape[1]) for (w, _) in prepared_params]
    flags = tuple(bool(residual and d_in == d_out) for (d_in, d_out) in dims)
    return _xla_forward(prepared_params, x, flags, compute_dtype)


def mlp_forward(prepared_params, x, *, residual=True,
                compute_dtype=jnp.bfloat16, tm_cap=1024, min_pallas_rows=32):
    """Forward pass matching MLP.forward (eval mode, no BN/LN).

    prepared_params : output of prepare_params() -> [(W [Din,Dout] bf16,
                      b [1,Dout] f32), ...]
    x               : [N, in_channels] float32
    """
    n, in_c = x.shape
    num_layers = len(prepared_params)
    dims = [(w.shape[0], w.shape[1]) for (w, _) in prepared_params]
    out_c = dims[-1][1]
    assert in_c == dims[0][0], "x channel dim must match first layer"

    # Residual gating on ORIGINAL feature dims (row count never changes, so
    # feature-dim equality == full-shape equality).
    residual_flags = tuple(bool(residual and d_in == d_out)
                           for (d_in, d_out) in dims)

    # Tiny batch: kernel launch + wrapper ops would be pure overhead.
    if n < min_pallas_rows:
        return _xla_forward(prepared_params, x, residual_flags, compute_dtype)

    compute_bytes = jnp.dtype(compute_dtype).itemsize
    row_mult = 16 if compute_bytes == 2 else 8

    # ---- even-split row tiling ---------------------------------------------
    # >=2 tiles whenever there is enough work so v7x's two TensorCores are
    # both used (harmless on single-TC v5e/v6e).
    num_tiles = max(1, pl.cdiv(n, tm_cap))
    if n >= 2 * row_mult:
        num_tiles = max(2, num_tiles)

    # ---- VMEM budget guard for the all-weights-resident design -------------
    vmem_cap = _vmem_capacity_bytes()
    budget = int(vmem_cap * 0.6)
    tm = _round_up(pl.cdiv(n, num_tiles), row_mult)
    for _ in range(64):
        tm = _round_up(pl.cdiv(n, num_tiles), row_mult)
        if (_vmem_footprint(tm, in_c, out_c, dims, compute_bytes) <= budget
                or tm <= row_mult):
            break
        num_tiles += 1
    n_pad = num_tiles * tm

    # x goes in unpadded in channels and in its original f32 dtype (the bf16
    # cast happens in-kernel); at most a tiny row pad is added here.
    x_in = x if n_pad == n else jnp.pad(x, ((0, n_pad - n), (0, 0)))

    # ---- BlockSpecs ---------------------------------------------------------
    # Constant (0, 0) block index => Pallas DMAs the weights/biases once and
    # keeps them VMEM-resident across the whole row grid.
    _resident = lambda i: (0, 0)
    in_specs = [pl.BlockSpec((tm, in_c), lambda i: (i, 0))]
    flat_inputs = [x_in]
    for (w, b) in prepared_params:
        in_specs.append(pl.BlockSpec(w.shape, _resident))
        in_specs.append(pl.BlockSpec(b.shape, _resident))
        flat_inputs += [w, b]
    out_spec = pl.BlockSpec((tm, out_c), lambda i: (i, 0))

    kernel = functools.partial(
        _fused_mlp_kernel,
        num_layers=num_layers,
        residual_flags=residual_flags,
        compute_dtype=compute_dtype,
    )

    footprint = _vmem_footprint(tm, in_c, out_c, dims, compute_bytes)
    vmem_limit = min(int(vmem_cap * 3 // 4),
                     max(32 * 1024 * 1024, 2 * footprint))

    out = pl.pallas_call(
        kernel,
        out_shape=jax.ShapeDtypeStruct((n_pad, out_c), x.dtype),
        grid=(num_tiles,),
        in_specs=in_specs,
        out_specs=out_spec,
        compiler_params=pltpu.CompilerParams(
            dimension_semantics=("parallel",),
            vmem_limit_bytes=vmem_limit,
        ),
    )(*flat_inputs)

    return out if n_pad == n else out[:n]


if __name__ == "__main__":
    key = jax.random.PRNGKey(0)
    k_param, k_x1, k_x2 = jax.random.split(key, 3)

    IN_C = 32
    HID_C = 64
    OUT_C = 32
    NUM_LAYERS = 3

    params = init_mlp_params(k_param, IN_C, HID_C, OUT_C, NUM_LAYERS)
    prepared = prepare_params(params)   # hoisted once, reused by every call

    # Case 1: tiny batch forced through the Pallas path (single row tile).
    N1 = 8
    x1 = jax.random.normal(k_x1, (N1, IN_C), jnp.float32)
    out1 = jax.block_until_ready(
        mlp_forward(prepared, x1, residual=True, min_pallas_rows=0))
    ref1 = _reference_forward(prepared, x1, residual=True)
    assert out1.shape == (N1, OUT_C)
    assert jnp.allclose(out1, ref1, atol=2e-2, rtol=2e-2), \
        float(jnp.max(jnp.abs(out1 - ref1)))

    # Case 2: non-multiple batch -> even-split grid (2 tiles of 352 rows,
    # only 4 padded rows; both v7x TensorCores get a tile).
    N2 = 700
    x2 = jax.random.normal(k_x2, (N2, IN_C), jnp.float32)
    out2 = jax.block_until_ready(mlp_forward(prepared, x2, residual=True))
    ref2 = _reference_forward(prepared, x2, residual=True)
    assert out2.shape == (N2, OUT_C)
    assert jnp.allclose(out2, ref2, atol=2e-2, rtol=2e-2), \
        float(jnp.max(jnp.abs(out2 - ref2)))

    # Case 3: tiny batch through the default XLA fallback (overhead path).
    out3 = jax.block_until_ready(mlp_forward(prepared, x1, residual=True))
    assert out3.shape == (N1, OUT_C)
    assert jnp.allclose(out3, ref1, atol=2e-2, rtol=2e-2), \
        float(jnp.max(jnp.abs(out3 - ref1)))

    print("KERNEL_OK")
</pallas_src>

<mosaic_0001>
module attributes {stable_mosaic.version = 11 : i64} {
  func.func @_fused_mlp_kernel(%arg0: i32, %arg1: memref<16x32xf32, #tpu.memory_space<vmem>>, %arg2: memref<32x64xbf16, #tpu.memory_space<vmem>>, %arg3: memref<1x64xf32, #tpu.memory_space<vmem>>, %arg4: memref<64x64xbf16, #tpu.memory_space<vmem>>, %arg5: memref<1x64xf32, #tpu.memory_space<vmem>>, %arg6: memref<64x32xbf16, #tpu.memory_space<vmem>>, %arg7: memref<1x32xf32, #tpu.memory_space<vmem>>, %arg8: memref<16x32xf32, #tpu.memory_space<vmem>>) attributes {dimension_semantics = [#tpu.dimension_semantics<parallel>], iteration_bounds = array<i64: 1>, scalar_prefetch = 0 : i64, scratch_operands = 0 : i64, tpu.core_type = #tpu.core_type<tc>, window_params = [{transform_indices = @transform_0, window_bounds = array<i64: 16, 32>}, {pipeline_mode = #tpu.pipeline_mode<synchronous>, transform_indices = @transform_1, window_bounds = array<i64: 32, 64>}, {pipeline_mode = #tpu.pipeline_mode<synchronous>, transform_indices = @transform_2, window_bounds = array<i64: 1, 64>}, {pipeline_mode = #tpu.pipeline_mode<synchronous>, transform_indices = @transform_3, window_bounds = array<i64: 64, 64>}, {pipeline_mode = #tpu.pipeline_mode<synchronous>, transform_indices = @transform_4, window_bounds = array<i64: 1, 64>}, {pipeline_mode = #tpu.pipeline_mode<synchronous>, transform_indices = @transform_5, window_bounds = array<i64: 64, 32>}, {pipeline_mode = #tpu.pipeline_mode<synchronous>, transform_indices = @transform_6, window_bounds = array<i64: 1, 32>}, {transform_indices = @transform_7, window_bounds = array<i64: 16, 32>}]} {
    %c0 = arith.constant 0 : index
    %c0_0 = arith.constant 0 : index
    %0 = vector.load %arg1[%c0, %c0_0] : memref<16x32xf32, #tpu.memory_space<vmem>>, vector<16x32xf32>
    %1 = arith.truncf %0 : vector<16x32xf32> to vector<16x32xbf16>
    %c0_1 = arith.constant 0 : index
    %c0_2 = arith.constant 0 : index
    %2 = vector.load %arg2[%c0_1, %c0_2] : memref<32x64xbf16, #tpu.memory_space<vmem>>, vector<32x64xbf16>
    %c0_3 = arith.constant 0 : index
    %c0_4 = arith.constant 0 : index
    %3 = vector.load %arg3[%c0_3, %c0_4] : memref<1x64xf32, #tpu.memory_space<vmem>>, vector<1x64xf32>
    %cst = arith.constant dense<0.000000e+00> : vector<16x64xf32>
    %4 = tpu.matmul %1, %2, %cst {dimension_numbers = #tpu.dot_dimension_numbers<[1], [0], [0], [1], [0, 0, 1, 1], [], []>} : vector<16x32xbf16>, vector<32x64xbf16>, vector<16x64xf32> -> vector<16x64xf32>
    %5 = vector.broadcast %3 : vector<1x64xf32> to vector<16x64xf32>
    %6 = arith.addf %4, %5 : vector<16x64xf32>
    %cst_5 = arith.constant 0.000000e+00 : f32
    %7 = vector.broadcast %cst_5 : f32 to vector<16x64xf32>
    %8 = arith.maximumf %6, %7 : vector<16x64xf32>
    %9 = arith.truncf %8 : vector<16x64xf32> to vector<16x64xbf16>
    %c0_6 = arith.constant 0 : index
    %c0_7 = arith.constant 0 : index
    %10 = vector.load %arg4[%c0_6, %c0_7] : memref<64x64xbf16, #tpu.memory_space<vmem>>, vector<64x64xbf16>
    %c0_8 = arith.constant 0 : index
    %c0_9 = arith.constant 0 : index
    %11 = vector.load %arg5[%c0_8, %c0_9] : memref<1x64xf32, #tpu.memory_space<vmem>>, vector<1x64xf32>
    %cst_10 = arith.constant dense<0.000000e+00> : vector<16x64xf32>
    %12 = tpu.matmul %9, %10, %cst_10 {dimension_numbers = #tpu.dot_dimension_numbers<[1], [0], [0], [1], [0, 0, 1, 1], [], []>} : vector<16x64xbf16>, vector<64x64xbf16>, vector<16x64xf32> -> vector<16x64xf32>
    %13 = vector.broadcast %11 : vector<1x64xf32> to vector<16x64xf32>
    %14 = arith.addf %12, %13 : vector<16x64xf32>
    %cst_11 = arith.constant 0.000000e+00 : f32
    %15 = vector.broadcast %cst_11 : f32 to vector<16x64xf32>
    %16 = arith.maximumf %14, %15 : vector<16x64xf32>
    %17 = arith.addf %16, %8 : vector<16x64xf32>
    %18 = arith.truncf %17 : vector<16x64xf32> to vector<16x64xbf16>
    %c0_12 = arith.constant 0 : index
    %c0_13 = arith.constant 0 : index
    %19 = vector.load %arg6[%c0_12, %c0_13] : memref<64x32xbf16, #tpu.memory_space<vmem>>, vector<64x32xbf16>
    %c0_14 = arith.constant 0 : index
    %c0_15 = arith.constant 0 : index
    %20 = vector.load %arg7[%c0_14, %c0_15] : memref<1x32xf32, #tpu.memory_space<vmem>>, vector<1x32xf32>
    %cst_16 = arith.constant dense<0.000000e+00> : vector<16x32xf32>
    %21 = tpu.matmul %18, %19, %cst_16 {dimension_numbers = #tpu.dot_dimension_numbers<[1], [0], [0], [1], [0, 0, 1, 1], [], []>} : vector<16x64xbf16>, vector<64x32xbf16>, vector<16x32xf32> -> vector<16x32xf32>
    %22 = vector.broadcast %20 : vector<1x32xf32> to vector<16x32xf32>
    %23 = arith.addf %21, %22 : vector<16x32xf32>
    %c0_17 = arith.constant 0 : index
    %c0_18 = arith.constant 0 : index
    %24 = vector.load %arg8[%c0_17, %c0_18] : memref<16x32xf32, #tpu.memory_space<vmem>>, vector<16x32xf32>
    tpu.vector_store %arg8[%c0_17, %c0_18], %23 {strides = array<i32>} : memref<16x32xf32, #tpu.memory_space<vmem>>, vector<16x32xf32>,
    return
  }
  func.func @transform_0(%arg0: i32) -> (i32, i32) {
    %c0_i32 = arith.constant 0 : i32
    %c0_i32_0 = arith.constant 0 : i32
    return %arg0, %c0_i32 : i32, i32
  }
  func.func @transform_1(%arg0: i32) -> (i32, i32) {
    %c0_i32 = arith.constant 0 : i32
    %c0_i32_0 = arith.constant 0 : i32
    %c0_i32_1 = arith.constant 0 : i32
    return %c0_i32, %c0_i32_0 : i32, i32
  }
  func.func @transform_2(%arg0: i32) -> (i32, i32) {
    %c0_i32 = arith.constant 0 : i32
    %c0_i32_0 = arith.constant 0 : i32
    %c0_i32_1 = arith.constant 0 : i32
    return %c0_i32, %c0_i32_0 : i32, i32
  }
  func.func @transform_3(%arg0: i32) -> (i32, i32) {
    %c0_i32 = arith.constant 0 : i32
    %c0_i32_0 = arith.constant 0 : i32
    %c0_i32_1 = arith.constant 0 : i32
    return %c0_i32, %c0_i32_0 : i32, i32
  }
  func.func @transform_4(%arg0: i32) -> (i32, i32) {
    %c0_i32 = arith.constant 0 : i32
    %c0_i32_0 = arith.constant 0 : i32
    %c0_i32_1 = arith.constant 0 : i32
    return %c0_i32, %c0_i32_0 : i32, i32
  }
  func.func @transform_5(%arg0: i32) -> (i32, i32) {
    %c0_i32 = arith.constant 0 : i32
    %c0_i32_0 = arith.constant 0 : i32
    %c0_i32_1 = arith.constant 0 : i32
    return %c0_i32, %c0_i32_0 : i32, i32
  }
  func.func @transform_6(%arg0: i32) -> (i32, i32) {
    %c0_i32 = arith.constant 0 : i32
    %c0_i32_0 = arith.constant 0 : i32
    %c0_i32_1 = arith.constant 0 : i32
    return %c0_i32, %c0_i32_0 : i32, i32
  }
  func.func @transform_7(%arg0: i32) -> (i32, i32) {
    %c0_i32 = arith.constant 0 : i32
    %c0_i32_0 = arith.constant 0 : i32
    return %arg0, %c0_i32 : i32, i32
  }
}

</mosaic_0001>

<bundles_post_ra>
// kernel: tpu_custom_call.1
= control target key start
LH: loop header
LB: loop body
LE: loop exit
PB: predicated region body
PF: predicated region fallthrough
CT: control target
= control target key end

     0   :  { %12 = vsyncpa [#allocation3], 0  ;;  %s431_s0 = inlined_call_operand.vmem [shape: f32[16,32], index: 0, kind: input, shape index: {}]   ;;  %s432_s1 = inlined_call_operand.hbm [shape: bf16[32,64], index: 1, kind: input, shape index: {}]   ;;  %s433_s2 = inlined_call_operand.vmem [shape: f32[1,64], index: 2, kind: input, shape index: {}]   ;;  %s434_s3 = inlined_call_operand.vmem [shape: bf16[64,64], index: 3, kind: input, shape index: {}]   ;;  %s435_s4 = inlined_call_operand.vmem [shape: f32[1,64], index: 4, kind: input, shape index: {}]   ;;  %s436_s5 = inlined_call_operand.vmem [shape: bf16[64,32], index: 5, kind: input, shape index: {}]   ;;  %s437_s6 = inlined_call_operand.vmem [shape: f32[1,32], index: 6, kind: input, shape index: {}]   ;;  %s438_s7 = inlined_call_operand.hbm [shape: f32[16,32], index: 7, kind: output, shape index: {}]  }
   0x1   :  { %13 = vsyncpa [#allocation4], 0  ;;  %s20_s26 = sshll.u32 %s432_s1, 4  ;;  %s335_s27 = smov [#allocation2]   ;;  %s21_s26 = int_to_ptr.hbm [resolvable:$true] %s20_s26 }
   0x2   :  { %s22_s28 = sshll.u32 %s335_s27, 4  ;;  %s336_s29 = smov 64   ;;  %s23_s28 = int_to_ptr.vmem [resolvable:$true] %s22_s28 }
   0x3   :  { %s337_s30 = smov 4  }
   0x4   :  { %28 = dma.hbm_to_vmem [thread:$0]  %s21_s26, 256, %s23_s28, [#allocation3], %s336_s29, %s336_s29, %s337_s30  }
   0x5   :  { %331 = dma.done.wait [#allocation3], 256  }
   0x6   :  { %332 = vsyncadd [#allocation3], 4294967040  ;;  %v265_v0 = vld [vmem:[#allocation2 + $0x8] sm:$0xff]  ;;  %v264_v1 = vld [vmem:[#allocation2] sm:$0xff]  ;;  %vm67_vm0 = vcmask 261120   ;;  %vm124_vm1 = vcmask 523264  }
   0x7   :  { %v44_v2 = vld [vmem:[%s431_s0] sm:$0xff]  ;;  %77 = vmatpush.bf16.msra.mxu0 %v265_v0  ;;  %v45_v3 = vld [vmem:[%s431_s0 + $0x8] sm:$0xff]  ;;  %v269_v5 = vld [vmem:[%s434_s3 + $0x18] sm:$0xff]  ;;  %s208_s9 = sshll.u32 %s438_s7, 4  ;;  %s339_s10 = smov 128   ;;  %s209_s9 = int_to_ptr.hbm [resolvable:$true] %s208_s9 }
   0x8   :  { %v46_v4 = vpack.c.bf16 %v45_v3, %v44_v2  ;;  %132 = vmatpush.bf16.msra.mxu1 %v269_v5  ;;  %v268_v6 = vld [vmem:[%s434_s3 + $0x10] sm:$0xff]  ;;  %v267_v7 = vld [vmem:[%s434_s3 + $0x8] sm:$0xff]  ;;  %v266_v8 = vld [vmem:[%s434_s3] sm:$0xff]  ;;  %s340_s11 = smov 8  }
   0x9   :  { %v280_v10 = vld [vmem:[%s433_s2] ss:$0 sm:$0xff]  ;;  %v273_v17 = vld [vmem:[%s436_s5 + $0x18] sm:$0xff]  ;;  %v272_v18 = vld [vmem:[%s436_s5 + $0x10] sm:$0xff] }
   0xa   :  { %190 = vmatpush.bf16.msra.mxu2 %v273_v17  ;;  %v271_v19 = vld [vmem:[%s436_s5 + $0x8] sm:$0xff]  ;;  %v270_v20 = vld [vmem:[%s436_s5] sm:$0xff]  ;;  %s338_s5 = smov [#allocation5]  }
   0xb   :  { %78 = vmatpush.bf16.msra.mxu0 %v264_v1  ;;  %v281_v22 = vld [vmem:[%s435_s4] ss:$0 sm:$0xff]  ;;  %s206_s4 = sshll.u32 %s338_s5, 4  ;;  %s207_s4 = int_to_ptr.vmem [resolvable:$true] %s206_s4 }
   0xc   :  { %133 = vmatpush.bf16.msra.mxu1 %v268_v6  ;;  %v282_v31 = vld [vmem:[%s437_s6] ss:$0 sm:$0xff] }
   0xe   :  { %229 = vmatmul.msk.bf16.vlgmr.msra.gmra.mxu0 %vm67_vm0, %v46_v4  ;;  %191 = vmatpush.bf16.msra.mxu2 %v272_v18 }
  0x10   :  { %134 = vmatpush.bf16.msra.mxu1 %v267_v7 }
  0x12   :  { %192 = vmatpush.bf16.msra.mxu2 %v271_v19 }
  0x14   :  { %135 = vmatpush.bf16.msra.mxu1 %v266_v8 }
  0x16   :  { %193 = vmatpush.bf16.msra.mxu2 %v270_v20 }
  0x8b   :  { %v80_v9 = vpop.f32.mrf.mxu0 }
  0x8c   :  { %v81_v11 = vadd.f32 %v280_v10, %v80_v9 }
  0x8e   :  { %v85_v14 = vmax.f32 %v81_v11, 0.0 }
  0x93   :  { %v82_v12 = vpop.f32.mrf.mxu0 }
  0x94   :  { %v83_v13 = vadd.f32 %v280_v10, %v82_v12 }
  0x96   :  { %v86_v15 = vmax.f32 %v83_v13, 0.0 }
  0x98   :  { %v87_v16 = vpack.c.bf16 %v86_v15, %v85_v14 }
  0x9a   :  { %246 = vmatmul.msk.bf16.vlgmr.msra.gmra.mxu1 %vm124_vm1, %v87_v16 }
 0x117   :  { %v137_v21 = vpop.f32.mrf.mxu1 }
 0x118   :  { %v138_v23 = vadd.f32 %v281_v22, %v137_v21 }
 0x11a   :  { %v142_v25 = vmax.f32 %v138_v23, 0.0 }
 0x11c   :  { %v144_v28 = vadd.f32 %v142_v25, %v85_v14 }
 0x11f   :  { %v139_v24 = vpop.f32.mrf.mxu1 }
 0x120   :  { %v140_v26 = vadd.f32 %v281_v22, %v139_v24 }
 0x122   :  { %v143_v27 = vmax.f32 %v140_v26, 0.0 }
 0x124   :  { %v145_v29 = vadd.f32 %v143_v27, %v86_v15 }
 0x126   :  { %v146_v30 = vpack.c.bf16 %v145_v29, %v144_v28 }
 0x128   :  { %263 = vmatmul.msk.bf16.vlgmr.msra.gmra.mxu2 %vm124_vm1, %v146_v30 }
 0x1ab   :  { %v195_v32 = vpop.f32.mrf.mxu2 }
 0x1ac   :  { %v196_v33 = vadd.f32 %v282_v31, %v195_v32 }
 0x1ae   :  { %200 = vst.msk [vmem:[#allocation5] sm:$0xff] %vm67_vm0, %v196_v33 }
 0x1b3   :  { %v197_v34 = vpop.f32.mrf.mxu2 }
 0x1b4   :  { %v198_v35 = vadd.f32 %v282_v31, %v197_v34 }
 0x1b6   :  { %201 = vst.msk [vmem:[#allocation5 + $0x8] sm:$0xff] %vm67_vm0, %v198_v35 }
 0x1b7   :  { %214 = dma.vmem_to_hbm [thread:$0]  %s207_s4, 256, %s209_s9, [#allocation4], %s339_s10, %s339_s10, %s340_s11  }
 0x1b8   :  { %333 = dma.done.wait [#allocation4], 256  }
 0x1b9   :  { %334 = vsyncadd [#allocation4], 4294967040 }
 0x1ba   :  { %219 = vsyncpa [#allocation3], 1 }
 0x1bb   :  { %220 = vsyncpa [#allocation4], 1 }

</bundles_post_ra>
